<compile_context>
chip_gen: v7x
topology: tpu7x:2x2x1
jax: 0.10.0
libtpu: 0.0.40
codegen_flags: <defaults>
</compile_context>

<pallas_src>
import math

import jax
import jax.numpy as jnp
from jax import lax
from jax.experimental import pallas as pl
from jax.experimental.pallas import tpu as pltpu

_SQRT2_INV = 1.0 / math.sqrt(2.0)


def _round_up(x, m):
    return ((x + m - 1) // m) * m


def _make_stem_kernel(TH, W_pad, KH, KW, Cin, Cout_pad, guard):
    M = TH * W_pad  # rows of the implicit matmul produced per grid step

    def kernel(x_ref, w_ref, b_ref, o_ref):
        # x_ref: (R_x, Cin)            f32   zero-padded, row-flattened image (resident per image)
        # w_ref: (KH*KW, Cin, Cout_pad) bf16 BN-scale-folded conv weights (resident)
        # b_ref: (1, Cout_pad)          f32  folded conv+BN bias (resident)
        # o_ref: (M, Cout_pad)          f32  lane-dense output slab for this row tile
        t = pl.program_id(1)
        row0 = t * M
        acc = jnp.zeros((M, Cout_pad), jnp.float32)
        for kh in range(KH):
            # sublane-aligned dynamic window; the kw shift is a static in-register slice
            base = pl.multiple_of(row0 + kh * W_pad, 8)
            xs_ext = x_ref[pl.ds(base, M + guard), :]                # (M+guard, Cin) f32
            for kw in range(KW):
                xs = xs_ext[kw:kw + M, :].astype(jnp.bfloat16)       # (M, Cin) bf16
                acc = acc + jnp.dot(xs, w_ref[kh * KW + kw],
                                    preferred_element_type=jnp.float32)
        y = acc + b_ref[...]                                         # folded BN bias
        # exact (erf-based) GELU, matching torch.nn.GELU() default
        o_ref[...] = 0.5 * y * (1.0 + lax.erf(y * _SQRT2_INV))

    return kernel


def stem_forward(x_nchw, w_oihw, b_conv, gamma, beta, run_mean, run_var,
                 eps=1e-5, tile_m=512):
    """Forward pass of Stem (stride=1, padding=0 -- the module defaults).

    x_nchw: (N, Cin, H, W); returns (N, Cout, Ho, Wo).
    tile_m: target matmul rows (output pixels) per grid step; size per generation's VMEM
            budget (<=512 is safe for v7x's 64 MiB scoped default, 1024 fine on v5e/v6e).
    """
    N, Cin, H, W = x_nchw.shape
    Cout, _, KH, KW = w_oihw.shape
    Ho, Wo = H - KH + 1, W - KW + 1  # stride=1, padding=0 (module defaults)
    # TODO(synk): training-mode BatchNorm (batch statistics) and stride/padding other than
    # the module defaults (1, 0) are not implemented; eval-mode running-stats forward only.

    # --- geometry / padding ---
    W_pad = _round_up(W, 8)                            # sublane-friendly row width
    Cout_pad = _round_up(Cout, 128)                    # lane-dense output channels
    TH = max(1, min(Ho, max(1, tile_m // W_pad)))      # output rows per grid step
    Ho_pad = _round_up(Ho, TH)
    H_pad = Ho_pad + KH - 1
    T = Ho_pad // TH
    M = TH * W_pad
    guard = 0 if KW == 1 else _round_up(KW - 1, 8)     # extra rows so kw-shifts stay in bounds
    R_x = H_pad * W_pad + guard

    # --- activation: NCHW -> NHWC, zero-pad, flatten spatial rows (no im2col in HBM) ---
    x = jnp.transpose(x_nchw, (0, 2, 3, 1)).astype(jnp.float32)        # (N, H, W, Cin)
    x = jnp.pad(x, ((0, 0), (0, H_pad - H), (0, W_pad - W), (0, 0)))
    x = x.reshape(N, H_pad * W_pad, Cin)
    x = jnp.pad(x, ((0, 0), (0, guard), (0, 0)))                       # (N, R_x, Cin)

    # --- fold conv bias + eval-mode BatchNorm into the weights and one bias vector ---
    inv_std = 1.0 / jnp.sqrt(run_var.astype(jnp.float32) + eps)
    scale = gamma.astype(jnp.float32) * inv_std                        # (Cout,)
    w = jnp.transpose(w_oihw, (2, 3, 1, 0)).astype(jnp.float32) * scale  # (KH, KW, Cin, Cout)
    w = w.reshape(KH * KW, Cin, Cout)
    w = jnp.pad(w, ((0, 0), (0, 0), (0, Cout_pad - Cout))).astype(jnp.bfloat16)
    bias = beta.astype(jnp.float32) + (b_conv.astype(jnp.float32)
                                       - run_mean.astype(jnp.float32)) * scale
    bias = jnp.pad(bias, (0, Cout_pad - Cout)).reshape(1, Cout_pad).astype(jnp.float32)

    kernel = _make_stem_kernel(TH, W_pad, KH, KW, Cin, Cout_pad, guard)

    cost = pl.CostEstimate(
        flops=2 * N * T * M * KH * KW * Cin * Cout_pad,
        transcendentals=N * T * M * Cout_pad,
        bytes_accessed=(x.size * 4 + w.size * 2 + bias.size * 4
                        + N * Ho_pad * W_pad * Cout_pad * 4),
    )

    out2d = pl.pallas_call(
        kernel,
        out_shape=jax.ShapeDtypeStruct((N, Ho_pad * W_pad, Cout_pad), jnp.float32),
        grid=(N, T),
        in_specs=[
            pl.BlockSpec((None, R_x, Cin), lambda n, t: (n, 0, 0)),          # resident per image
            pl.BlockSpec((KH * KW, Cin, Cout_pad), lambda n, t: (0, 0, 0)),  # resident weights
            pl.BlockSpec((1, Cout_pad), lambda n, t: (0, 0)),                # resident bias
        ],
        out_specs=pl.BlockSpec((None, M, Cout_pad), lambda n, t: (n, t, 0)),
        compiler_params=pltpu.CompilerParams(
            dimension_semantics=("parallel", "parallel"),
            vmem_limit_bytes=64 * 1024 * 1024,
        ),
        cost_estimate=cost,
    )(x, w, bias)

    out = out2d.reshape(N, Ho_pad, W_pad, Cout_pad)[:, :Ho, :Wo, :Cout]
    return jnp.transpose(out, (0, 3, 1, 2))  # back to NCHW


def stem_reference(x_nchw, w_oihw, b_conv, gamma, beta, run_mean, run_var, eps=1e-5):
    """Pure-JAX f32 reference (mirrors PyTorch Conv2d -> BatchNorm2d(eval) -> GELU)."""
    y = lax.conv_general_dilated(
        x_nchw.astype(jnp.float32), w_oihw.astype(jnp.float32),
        window_strides=(1, 1), padding="VALID",
        dimension_numbers=("NCHW", "OIHW", "NCHW"))
    y = y + b_conv.reshape(1, -1, 1, 1)
    inv_std = 1.0 / jnp.sqrt(run_var + eps)
    y = (y - run_mean.reshape(1, -1, 1, 1)) * (gamma * inv_std).reshape(1, -1, 1, 1) \
        + beta.reshape(1, -1, 1, 1)
    return 0.5 * y * (1.0 + lax.erf(y * _SQRT2_INV))


if __name__ == "__main__":
    # small shapes consistent with the module: batch=2, in_channels=4, H=W=16, out_channels=32
    N, Cin, H, W = 2, 4, 16, 16
    Cout, K = 32, 3

    key = jax.random.PRNGKey(0)
    kx, kwk, kb, kg, kbt, km, kv = jax.random.split(key, 7)

    x = jax.random.normal(kx, (N, Cin, H, W), dtype=jnp.float32)
    w = jax.random.normal(kwk, (Cout, Cin, K, K), dtype=jnp.float32) * 0.1
    b = jax.random.normal(kb, (Cout,), dtype=jnp.float32) * 0.1
    gamma = 1.0 + 0.1 * jax.random.normal(kg, (Cout,), dtype=jnp.float32)
    beta = 0.1 * jax.random.normal(kbt, (Cout,), dtype=jnp.float32)
    run_mean = 0.1 * jax.random.normal(km, (Cout,), dtype=jnp.float32)
    run_var = 0.5 + jnp.abs(jax.random.normal(kv, (Cout,), dtype=jnp.float32))

    # tile_m=128 exercises the multi-row-tile path at these toy shapes
    # (use the default 512 -- or larger on v5e/v6e -- at production sizes).
    out = stem_forward(x, w, b, gamma, beta, run_mean, run_var, tile_m=128)
    out = jax.block_until_ready(out)

    ref = stem_reference(x, w, b, gamma, beta, run_mean, run_var)
    assert out.shape == (N, Cout, H - K + 1, W - K + 1), out.shape
    # bf16 matmul inputs (f32 accumulation/epilogue) -> compare with a bf16-level tolerance
    max_err = float(jnp.max(jnp.abs(out - ref)))
    assert jnp.allclose(out, ref, atol=2e-2, rtol=2e-2), max_err

    print("KERNEL_OK")
</pallas_src>

<mosaic_0001>
module attributes {stable_mosaic.version = 11 : i64} {
  func.func @kernel(%arg0: i32, %arg1: i32, %arg2: memref<1x296x4xf32, #tpu.memory_space<vmem>>, %arg3: memref<9x4x128xbf16, #tpu.memory_space<vmem>>, %arg4: memref<1x128xf32, #tpu.memory_space<vmem>>, %arg5: memref<1x128x128xf32, #tpu.memory_space<vmem>>) attributes {dimension_semantics = [#tpu.dimension_semantics<parallel>, #tpu.dimension_semantics<parallel>], iteration_bounds = array<i64: 2, 2>, scalar_prefetch = 0 : i64, scratch_operands = 0 : i64, tpu.core_type = #tpu.core_type<tc>, window_params = [{transform_indices = @transform_0, window_bounds = array<i64: 1, 296, 4>}, {pipeline_mode = #tpu.pipeline_mode<synchronous>, transform_indices = @transform_1, window_bounds = array<i64: 9, 4, 128>}, {pipeline_mode = #tpu.pipeline_mode<synchronous>, transform_indices = @transform_2, window_bounds = array<i64: 1, 128>}, {transform_indices = @transform_3, window_bounds = array<i64: 1, 128, 128>}]} {
    %c128_i32 = arith.constant 128 : i32
    %0 = arith.muli %arg1, %c128_i32 : i32
    %cst = arith.constant 0.000000e+00 : f32
    %1 = vector.broadcast %cst : f32 to vector<128x128xf32>
    %c0_i32 = arith.constant 0 : i32
    %2 = arith.addi %0, %c0_i32 : i32
    %3 = tpu.assume_multiple %2, 8 : i32
    %c0 = arith.constant 0 : index
    %4 = arith.index_cast %3 : i32 to index
    %c0_0 = arith.constant 0 : index
    %5 = vector.load %arg2[%c0, %4, %c0_0] : memref<1x296x4xf32, #tpu.memory_space<vmem>>, vector<1x136x4xf32>
    %6 = vector.shape_cast %5 : vector<1x136x4xf32> to vector<136x4xf32>
    %7 = vector.extract_strided_slice %6 {offsets = [0, 0], sizes = [128, 4], strides = [1, 1]} : vector<136x4xf32> to vector<128x4xf32>
    %8 = arith.truncf %7 : vector<128x4xf32> to vector<128x4xbf16>
    %c0_1 = arith.constant 0 : index
    %c0_2 = arith.constant 0 : index
    %c0_3 = arith.constant 0 : index
    %9 = vector.load %arg3[%c0_1, %c0_2, %c0_3] : memref<9x4x128xbf16, #tpu.memory_space<vmem>>, vector<1x4x128xbf16>
    %10 = vector.shape_cast %9 : vector<1x4x128xbf16> to vector<4x128xbf16>
    %cst_4 = arith.constant dense<0.000000e+00> : vector<128x128xf32>
    %11 = tpu.matmul %8, %10, %cst_4 {dimension_numbers = #tpu.dot_dimension_numbers<[1], [0], [0], [1], [0, 0, 1, 1], [], []>} : vector<128x4xbf16>, vector<4x128xbf16>, vector<128x128xf32> -> vector<128x128xf32>
    %12 = arith.addf %1, %11 : vector<128x128xf32>
    %13 = vector.extract_strided_slice %6 {offsets = [1, 0], sizes = [128, 4], strides = [1, 1]} : vector<136x4xf32> to vector<128x4xf32>
    %14 = arith.truncf %13 : vector<128x4xf32> to vector<128x4xbf16>
    %c1 = arith.constant 1 : index
    %c0_5 = arith.constant 0 : index
    %c0_6 = arith.constant 0 : index
    %15 = vector.load %arg3[%c1, %c0_5, %c0_6] : memref<9x4x128xbf16, #tpu.memory_space<vmem>>, vector<1x4x128xbf16>
    %16 = vector.shape_cast %15 : vector<1x4x128xbf16> to vector<4x128xbf16>
    %cst_7 = arith.constant dense<0.000000e+00> : vector<128x128xf32>
    %17 = tpu.matmul %14, %16, %cst_7 {dimension_numbers = #tpu.dot_dimension_numbers<[1], [0], [0], [1], [0, 0, 1, 1], [], []>} : vector<128x4xbf16>, vector<4x128xbf16>, vector<128x128xf32> -> vector<128x128xf32>
    %18 = arith.addf %12, %17 : vector<128x128xf32>
    %19 = vector.extract_strided_slice %6 {offsets = [2, 0], sizes = [128, 4], strides = [1, 1]} : vector<136x4xf32> to vector<128x4xf32>
    %20 = arith.truncf %19 : vector<128x4xf32> to vector<128x4xbf16>
    %c2 = arith.constant 2 : index
    %c0_8 = arith.constant 0 : index
    %c0_9 = arith.constant 0 : index
    %21 = vector.load %arg3[%c2, %c0_8, %c0_9] : memref<9x4x128xbf16, #tpu.memory_space<vmem>>, vector<1x4x128xbf16>
    %22 = vector.shape_cast %21 : vector<1x4x128xbf16> to vector<4x128xbf16>
    %cst_10 = arith.constant dense<0.000000e+00> : vector<128x128xf32>
    %23 = tpu.matmul %20, %22, %cst_10 {dimension_numbers = #tpu.dot_dimension_numbers<[1], [0], [0], [1], [0, 0, 1, 1], [], []>} : vector<128x4xbf16>, vector<4x128xbf16>, vector<128x128xf32> -> vector<128x128xf32>
    %24 = arith.addf %18, %23 : vector<128x128xf32>
    %c16_i32 = arith.constant 16 : i32
    %25 = arith.addi %0, %c16_i32 : i32
    %26 = tpu.assume_multiple %25, 8 : i32
    %c0_11 = arith.constant 0 : index
    %27 = arith.index_cast %26 : i32 to index
    %c0_12 = arith.constant 0 : index
    %28 = vector.load %arg2[%c0_11, %27, %c0_12] : memref<1x296x4xf32, #tpu.memory_space<vmem>>, vector<1x136x4xf32>
    %29 = vector.shape_cast %28 : vector<1x136x4xf32> to vector<136x4xf32>
    %30 = vector.extract_strided_slice %29 {offsets = [0, 0], sizes = [128, 4], strides = [1, 1]} : vector<136x4xf32> to vector<128x4xf32>
    %31 = arith.truncf %30 : vector<128x4xf32> to vector<128x4xbf16>
    %c3 = arith.constant 3 : index
    %c0_13 = arith.constant 0 : index
    %c0_14 = arith.constant 0 : index
    %32 = vector.load %arg3[%c3, %c0_13, %c0_14] : memref<9x4x128xbf16, #tpu.memory_space<vmem>>, vector<1x4x128xbf16>
    %33 = vector.shape_cast %32 : vector<1x4x128xbf16> to vector<4x128xbf16>
    %cst_15 = arith.constant dense<0.000000e+00> : vector<128x128xf32>
    %34 = tpu.matmul %31, %33, %cst_15 {dimension_numbers = #tpu.dot_dimension_numbers<[1], [0], [0], [1], [0, 0, 1, 1], [], []>} : vector<128x4xbf16>, vector<4x128xbf16>, vector<128x128xf32> -> vector<128x128xf32>
    %35 = arith.addf %24, %34 : vector<128x128xf32>
    %36 = vector.extract_strided_slice %29 {offsets = [1, 0], sizes = [128, 4], strides = [1, 1]} : vector<136x4xf32> to vector<128x4xf32>
    %37 = arith.truncf %36 : vector<128x4xf32> to vector<128x4xbf16>
    %c4 = arith.constant 4 : index
    %c0_16 = arith.constant 0 : index
    %c0_17 = arith.constant 0 : index
    %38 = vector.load %arg3[%c4, %c0_16, %c0_17] : memref<9x4x128xbf16, #tpu.memory_space<vmem>>, vector<1x4x128xbf16>
    %39 = vector.shape_cast %38 : vector<1x4x128xbf16> to vector<4x128xbf16>
    %cst_18 = arith.constant dense<0.000000e+00> : vector<128x128xf32>
    %40 = tpu.matmul %37, %39, %cst_18 {dimension_numbers = #tpu.dot_dimension_numbers<[1], [0], [0], [1], [0, 0, 1, 1], [], []>} : vector<128x4xbf16>, vector<4x128xbf16>, vector<128x128xf32> -> vector<128x128xf32>
    %41 = arith.addf %35, %40 : vector<128x128xf32>
    %42 = vector.extract_strided_slice %29 {offsets = [2, 0], sizes = [128, 4], strides = [1, 1]} : vector<136x4xf32> to vector<128x4xf32>
    %43 = arith.truncf %42 : vector<128x4xf32> to vector<128x4xbf16>
    %c5 = arith.constant 5 : index
    %c0_19 = arith.constant 0 : index
    %c0_20 = arith.constant 0 : index
    %44 = vector.load %arg3[%c5, %c0_19, %c0_20] : memref<9x4x128xbf16, #tpu.memory_space<vmem>>, vector<1x4x128xbf16>
    %45 = vector.shape_cast %44 : vector<1x4x128xbf16> to vector<4x128xbf16>
    %cst_21 = arith.constant dense<0.000000e+00> : vector<128x128xf32>
    %46 = tpu.matmul %43, %45, %cst_21 {dimension_numbers = #tpu.dot_dimension_numbers<[1], [0], [0], [1], [0, 0, 1, 1], [], []>} : vector<128x4xbf16>, vector<4x128xbf16>, vector<128x128xf32> -> vector<128x128xf32>
    %47 = arith.addf %41, %46 : vector<128x128xf32>
    %c32_i32 = arith.constant 32 : i32
    %48 = arith.addi %0, %c32_i32 : i32
    %49 = tpu.assume_multiple %48, 8 : i32
    %c0_22 = arith.constant 0 : index
    %50 = arith.index_cast %49 : i32 to index
    %c0_23 = arith.constant 0 : index
    %51 = vector.load %arg2[%c0_22, %50, %c0_23] : memref<1x296x4xf32, #tpu.memory_space<vmem>>, vector<1x136x4xf32>
    %52 = vector.shape_cast %51 : vector<1x136x4xf32> to vector<136x4xf32>
    %53 = vector.extract_strided_slice %52 {offsets = [0, 0], sizes = [128, 4], strides = [1, 1]} : vector<136x4xf32> to vector<128x4xf32>
    %54 = arith.truncf %53 : vector<128x4xf32> to vector<128x4xbf16>
    %c6 = arith.constant 6 : index
    %c0_24 = arith.constant 0 : index
    %c0_25 = arith.constant 0 : index
    %55 = vector.load %arg3[%c6, %c0_24, %c0_25] : memref<9x4x128xbf16, #tpu.memory_space<vmem>>, vector<1x4x128xbf16>
    %56 = vector.shape_cast %55 : vector<1x4x128xbf16> to vector<4x128xbf16>
    %cst_26 = arith.constant dense<0.000000e+00> : vector<128x128xf32>
    %57 = tpu.matmul %54, %56, %cst_26 {dimension_numbers = #tpu.dot_dimension_numbers<[1], [0], [0], [1], [0, 0, 1, 1], [], []>} : vector<128x4xbf16>, vector<4x128xbf16>, vector<128x128xf32> -> vector<128x128xf32>
    %58 = arith.addf %47, %57 : vector<128x128xf32>
    %59 = vector.extract_strided_slice %52 {offsets = [1, 0], sizes = [128, 4], strides = [1, 1]} : vector<136x4xf32> to vector<128x4xf32>
    %60 = arith.truncf %59 : vector<128x4xf32> to vector<128x4xbf16>
    %c7 = arith.constant 7 : index
    %c0_27 = arith.constant 0 : index
    %c0_28 = arith.constant 0 : index
    %61 = vector.load %arg3[%c7, %c0_27, %c0_28] : memref<9x4x128xbf16, #tpu.memory_space<vmem>>, vector<1x4x128xbf16>
    %62 = vector.shape_cast %61 : vector<1x4x128xbf16> to vector<4x128xbf16>
    %cst_29 = arith.constant dense<0.000000e+00> : vector<128x128xf32>
    %63 = tpu.matmul %60, %62, %cst_29 {dimension_numbers = #tpu.dot_dimension_numbers<[1], [0], [0], [1], [0, 0, 1, 1], [], []>} : vector<128x4xbf16>, vector<4x128xbf16>, vector<128x128xf32> -> vector<128x128xf32>
    %64 = arith.addf %58, %63 : vector<128x128xf32>
    %65 = vector.extract_strided_slice %52 {offsets = [2, 0], sizes = [128, 4], strides = [1, 1]} : vector<136x4xf32> to vector<128x4xf32>
    %66 = arith.truncf %65 : vector<128x4xf32> to vector<128x4xbf16>
    %c8 = arith.constant 8 : index
    %c0_30 = arith.constant 0 : index
    %c0_31 = arith.constant 0 : index
    %67 = vector.load %arg3[%c8, %c0_30, %c0_31] : memref<9x4x128xbf16, #tpu.memory_space<vmem>>, vector<1x4x128xbf16>
    %68 = vector.shape_cast %67 : vector<1x4x128xbf16> to vector<4x128xbf16>
    %cst_32 = arith.constant dense<0.000000e+00> : vector<128x128xf32>
    %69 = tpu.matmul %66, %68, %cst_32 {dimension_numbers = #tpu.dot_dimension_numbers<[1], [0], [0], [1], [0, 0, 1, 1], [], []>} : vector<128x4xbf16>, vector<4x128xbf16>, vector<128x128xf32> -> vector<128x128xf32>
    %70 = arith.addf %64, %69 : vector<128x128xf32>
    %c0_33 = arith.constant 0 : index
    %c0_34 = arith.constant 0 : index
    %71 = vector.load %arg4[%c0_33, %c0_34] : memref<1x128xf32, #tpu.memory_space<vmem>>, vector<1x128xf32>
    %72 = vector.broadcast %71 : vector<1x128xf32> to vector<128x128xf32>
    %73 = arith.addf %70, %72 : vector<128x128xf32>
    %cst_35 = arith.constant 5.000000e-01 : f32
    %74 = vector.broadcast %cst_35 : f32 to vector<128x128xf32>
    %75 = arith.mulf %74, %73 : vector<128x128xf32>
    %cst_36 = arith.constant 0.707106769 : f32
    %76 = vector.broadcast %cst_36 : f32 to vector<128x128xf32>
    %77 = arith.mulf %73, %76 : vector<128x128xf32>
    %78 = math.erf %77 : vector<128x128xf32>
    %cst_37 = arith.constant 1.000000e+00 : f32
    %79 = vector.broadcast %cst_37 : f32 to vector<128x128xf32>
    %80 = arith.addf %79, %78 : vector<128x128xf32>
    %81 = arith.mulf %75, %80 : vector<128x128xf32>
    %c0_38 = arith.constant 0 : index
    %c0_39 = arith.constant 0 : index
    %c0_40 = arith.constant 0 : index
    %82 = vector.load %arg5[%c0_38, %c0_39, %c0_40] : memref<1x128x128xf32, #tpu.memory_space<vmem>>, vector<1x128x128xf32>
    %83 = vector.shape_cast %82 : vector<1x128x128xf32> to vector<128x128xf32>
    %84 = vector.shape_cast %81 : vector<128x128xf32> to vector<1x128x128xf32>
    tpu.vector_store %arg5[%c0_38, %c0_39, %c0_40], %84 {strides = array<i32>} : memref<1x128x128xf32, #tpu.memory_space<vmem>>, vector<1x128x128xf32>,
    return
  }
  func.func @transform_0(%arg0: i32, %arg1: i32) -> (i32, i32, i32) {
    %c0_i32 = arith.constant 0 : i32
    %c0_i32_0 = arith.constant 0 : i32
    %c0_i32_1 = arith.constant 0 : i32
    return %arg0, %c0_i32, %c0_i32_0 : i32, i32, i32
  }
  func.func @transform_1(%arg0: i32, %arg1: i32) -> (i32, i32, i32) {
    %c0_i32 = arith.constant 0 : i32
    %c0_i32_0 = arith.constant 0 : i32
    %c0_i32_1 = arith.constant 0 : i32
    %c0_i32_2 = arith.constant 0 : i32
    return %c0_i32, %c0_i32_0, %c0_i32_1 : i32, i32, i32
  }
  func.func @transform_2(%arg0: i32, %arg1: i32) -> (i32, i32) {
    %c0_i32 = arith.constant 0 : i32
    %c0_i32_0 = arith.constant 0 : i32
    %c0_i32_1 = arith.constant 0 : i32
    return %c0_i32, %c0_i32_0 : i32, i32
  }
  func.func @transform_3(%arg0: i32, %arg1: i32) -> (i32, i32, i32) {
    %c0_i32 = arith.constant 0 : i32
    %c0_i32_0 = arith.constant 0 : i32
    return %arg0, %arg1, %c0_i32 : i32, i32, i32
  }
}

</mosaic_0001>

<bundles_post_ra>
// kernel: tpu_custom_call.1
= control target key start
LH: loop header
LB: loop body
LE: loop exit
PB: predicated region body
PF: predicated region fallthrough
CT: control target
= control target key end

     0   :  { %s3662_s0 = inlined_call_operand.hbm [shape: f32[2,296,4], index: 0, kind: input, shape index: {}]   ;;  %s3663_s1 = inlined_call_operand.hbm [shape: bf16[9,4,128], index: 1, kind: input, shape index: {}]   ;;  %s3664_s2 = inlined_call_operand.hbm [shape: f32[1,128], index: 2, kind: input, shape index: {}]   ;;  %s3665_s3 = inlined_call_operand.hbm [shape: f32[2,256,128], index: 3, kind: output, shape index: {}]  }
   0x1   :  { %3675 = sst [smem:[#allocation16_spill]] %s3663_s1 }
   0x2   :  { %3676 = sst [smem:[#allocation17_spill]] %s3664_s2 }
   0x3   :  { %8 = vsyncpa [#allocation3], 0 }
   0x4   :  { %10 = vsyncpa [#allocation3 + $0x1], 0 }
   0x5   :  { %11 = vsyncpa [#allocation6], 0 }
   0x6   :  { %12 = vsyncpa [#allocation4], 0 }
   0x7   :  { %14 = vsyncpa [#allocation4 + $0x1], 0  ;;  %s2990_s12 = smov 0   ;;  %s2992_s13 = smov 0  }
   0x8   :  { %s2994_s14 = smov 0   ;;  %s2996_s15 = smov 0  }
   0x9   :  { %s2998_s16 = smov 0   ;;  %s3000_s17 = smov 0  }
   0xa   :  { %s3002_s18 = smov 0   ;;  %s3004_s19 = smov 0  }
   0xb   :  { %s3006_s20 = smov 0   ;;  %s3008_s21 = smov 0  }
   0xc   :  { %s3010_s22 = smov 0  }
   0xd LB: > { %3677 = sst [smem:[#allocation12_spill]] %s2918_s12  ;;  %s2072_s23 = sadd.s32 4294967295, %s2958_s22   ;;  %s2958_s22 = sphi %s3010_s22, %s20_s22   ;;  %s2954_s21 = sphi %s3008_s21, %s3708_s21   ;;  %s2950_s20 = sphi %s3006_s20, %s3700_s20   ;;  %s2946_s19 = sphi %s3004_s19, %s3707_s19   ;;  %s2942_s18 = sphi %s3002_s18, %s3699_s18   ;;  %s2938_s17 = sphi %s3000_s17, %s3706_s17   ;;  %s2934_s16 = sphi %s2998_s16, %s3705_s16   ;;  %s2930_s15 = sphi %s2996_s15, %s3704_s15   ;;  %s2926_s14 = sphi %s2994_s14, %s3703_s14   ;;  %s2922_s13 = sphi %s2992_s13, %s3702_s13   ;;  %s2918_s12 = sphi %s2990_s12, %s3701_s12  }
   0xe   : > { %3678 = sst [smem:[#allocation13_spill]] %s2950_s20  ;;  %s2073_s24 = sadd.s32 4294967294, %s2958_s22  }
   0xf   : > { %p52_p0 = scmp.ne.s32.totalorder %s2934_s16, %s2930_s15  ;;  %p3046_p1 = scmp.eq.s32.totalorder %s2072_s23, 0 }
  0x10   : > { %p119_p2 = scmp.ne.s32.totalorder %s2926_s14, %s2922_s13  ;;  %p120_p4 = scmp.eq.s32.totalorder %s2072_s23, 3 }
  0x11   : > { %s3679_s25 = scalar_select %p3046_p1, 1, 0 }
  0x12   : > { %p3055_p3 = por %p3046_p1, %p52_p0  ;;  %p125_p5 = scmp.ne.s32.totalorder %s2922_s13, %s2918_s12 }
  0x13   : > { %p126_p6 = scmp.eq.s32.totalorder %s2073_s24, 3  ;;  %p3061_p7 = por %p120_p4, %p119_p2 }
  0x14   : > { %s3680_s27 = scalar_select %p3055_p3, 1, 0 }
  0x15   : > { %s3681_s28 = scalar_select %p3061_p7, 1, 0 }
  0x16   : > { %p2074_p8 = scmp.ge.s32.totalorder %s2958_s22, 1  ;;  %p3066_p9 = por %p126_p6, %p125_p5 }
  0x17   : > { %p133_p10 = scmp.lt.s32.totalorder %s2958_s22, 5  ;;  %s2960_s4 = smov [#allocation5]  }
  0x18   : > { %s3682_s29 = scalar_select %p3066_p9, 1, 0 }
  0x19   : > { %p3071_p11 = pnand %p2074_p8, %p133_p10  ;;  %s145_s5 = sshll.u32 %s2960_s4, 4  ;;  %s146_s5 = int_to_ptr.vmem [resolvable:$true] %s145_s5 }
  0x1a   : > { %3683 = sst [smem:[#allocation14_spill]] %s3682_s29  ;;  %s2961_s7 = smov [#allocation7]  }
  0x1b   : > { %s3684_s30 = scalar_select %p3071_p11, 1, 0 }
  0x1c   : > { %p2597_p12 = pneg %p3071_p11  ;;  %s159_s8 = sshll.u32 %s2961_s7, 4  ;;  %s3083_s8 = int_to_ptr.vmem [resolvable:$true] %s159_s8 }
  0x1d   : > { %s3686_s1 = sld [smem:[#allocation16_spill]] }
  0x1e   : > { %p3079_p13 = pnand %p2597_p12, %p3046_p1 }
  0x20   : > { %p2748_p2 = pneg %p3079_p13 }
  0x23   : > { %s2746_s11 = scalar_lea.hbm %s3686_s1, 288 }
  0x24   : > { %p2747_p0 = scmp.ne.s32.totalorder %s3686_s1, %s2746_s11  ;;  %p2753_p6 = scmp.lt.u32.totalorder %s2746_s11, %s3686_s1 }
  0x26   : > { %p2749_p4 = pnand %p2748_p2, %p2747_p0 }
  0x28   : > { %p2750_p5 = pneg %p2749_p4 }
  0x2a   : > { %p2755_p8 = pnand %p2753_p6, %p2750_p5 }
  0x2c   : > { %2758 = shalt.err (!%p2755_p8)
}
  0x2d   : > { %s2759_s7 = scalar_lea.vmem %s146_s5, 288  ;;  %p2767_p7 = scmp.lt.s32.totalorder %s146_s5, %s146_s5 }
  0x2e   : > { %p2760_p10 = scmp.ne.s32.totalorder %s146_s5, %s2759_s7  ;;  %p2768_p1 = scmp.lt.s32.totalorder %s2759_s7, %s2759_s7 }
  0x30   : > { %p2762_p12 = pnand %p2760_p10, %p2748_p2  ;;  %p2769_p3 = por %p2768_p1, %p2767_p7 }
  0x32   : > { %p2763_p9 = pneg %p2762_p12 }
  0x34   : > { %p2770_p11 = pnand %p2769_p3, %p2763_p9 }
  0x36   : > { %2773 = shalt.err (!%p2770_p11)
}
  0x37   : > { %s2962_s9 = smov 32   ;;  %s2963_s10 = smov 2  }
  0x38   : > { %2600 = dma.hbm_to_vmem [thread:$0]  (!%p3079_p13), %s3686_s1, 288, %s146_s5, [#allocation6], %s2962_s9, %s2962_s9, %s2963_s10  }
  0x39   : > { %s3687_s2 = sld [smem:[#allocation17_spill]] }
  0x3f   : > { %s2774_s4 = scalar_lea.hbm %s3687_s2, 16 }
  0x40   : > { %p2775_p0 = scmp.ne.s32.totalorder %s3687_s2, %s2774_s4  ;;  %p2781_p7 = scmp.lt.u32.totalorder %s2774_s4, %s3687_s2 }
  0x42   : > { %p2777_p1 = pnand %p2775_p0, %p2748_p2 }
  0x44   : > { %p2778_p3 = pneg %p2777_p1 }
  0x46   : > { %p2783_p9 = pnand %p2781_p7, %p2778_p3 }
  0x48   : > { %2786 = shalt.err (!%p2783_p9)
}
  0x49   : > { %s2787_s5 = scalar_lea.vmem %s3083_s8, 16  ;;  %s2794_s26 = scalar_lea.vmem %s3083_s8, 32 }
  0x4a   : > { %p2788_p11 = scmp.ne.s32.totalorder %s3083_s8, %s2787_s5  ;;  %p2795_p6 = scmp.lt.s32.totalorder %s3083_s8, %s3083_s8 }
  0x4b   : > { %p2796_p8 = scmp.lt.s32.totalorder %s2794_s26, %s2787_s5 }
  0x4c   : > { %p2790_p4 = pnand %p2788_p11, %p2748_p2 }
  0x4d   : > { %p2797_p10 = por %p2796_p8, %p2795_p6 }
  0x4e   : > { %p2791_p5 = pneg %p2790_p4 }
  0x50   : > { %p2798_p12 = pnand %p2797_p10, %p2791_p5 }
  0x52   : > { %2801 = shalt.err (!%p2798_p12)
}
  0x53   : > { %2603 = dma.hbm_to_vmem [thread:$0]  (!%p3079_p13), %s3687_s2, 16, %s3083_s8, [#allocation6]  }
  0x54   : > { %s29_s9 = sadd.s32 1, %s2950_s20  ;;  %s32_s10 = sadd.s32 1, %s2954_s21 }
  0x55   : > { %p30_p2 = scmp.ge.s32.totalorder %s29_s9, 2  ;;  %s39_s6 = sadd.s32 1, %s2938_s17 }
  0x56   : > { %p46_p0 = scmp.ne.s32.totalorder %s2938_s17, %s2934_s16  ;;  %p47_p1 = scmp.eq.s32.totalorder %s2958_s22, 0 }
  0x57   : > { %s3710_s9 = smov (%p30_p2, %s29_s9), 0  ;;  %s3712_s10 = smov (!%p30_p2, %s32_s10), %s2954_s21 }
  0x58   : > { %3688 = sst [smem:[#allocation15_spill]] %s3710_s9  ;;  %p3142_p3 = por %p47_p1, %p46_p0 }
  0x59   : > { %s105_s15 = ssub.s32 %s2950_s20, %s3710_s9  ;;  %p34_p13 = scmp.ge.s32.totalorder %s3712_s10, 2 }
  0x5a   : > { %p2614_p7 = scmp.lt.s32.totalorder %s2958_s22, 4  ;;  %s170_s8 = sand.u32 1, %s2938_s17  }
  0x5b   : > { %s2583_s23 = smul.u32 4736, %s2954_s21  ;;  %s3714_s10 = smov (%p34_p13, %s3712_s10), 0 }
  0x5c   : > { %s2582_s24 = smul.u32 296, %s170_s8  ;;  %s36_s4 = ssub.s32 %s2954_s21, %s3714_s10 }
  0x5d   : > { %s3158_s26 = scalar_lea.hbm %s3662_s0, %s2583_s23  ;;  %p37_p9 = scmp.eq.s32.totalorder %s36_s4, 0 }
  0x5e   : > { %s106_s12 = sor.u32 %s105_s15, %s36_s4  ;;  %s3690_s1 = sadd.s32 1, %s2926_s14 }
  0x5f   : > { %p107_p11 = scmp.eq.s32.totalorder %s106_s12, 0  ;;  %s174_s9 = scalar_lea.vmem [#allocation2], %s2582_s24 }
  0x60   : > { %s3161_s29 = scalar_select %p37_p9, %s2938_s17, %s39_s6  }
  0x61   : > { %s3166_s2 = scalar_select %p107_p11, %s2926_s14, %s3690_s1  }
  0x62   : > { %s181_s20 = sshll.u32 %s174_s9, 4  ;;  %p3172_p4 = pnand %p2614_p7, %p3142_p3  ;;  %s3176_s20 = int_to_ptr.vmem [resolvable:$true] %s181_s20 }
  0x63   : > { %s3178_s15 = scalar_lea.sflag [#allocation3], %s170_s8  ;;  %s2802_s6 = scalar_lea.hbm %s3158_s26, 4736 }
  0x64   : > { %p2803_p5 = scmp.ne.s32.totalorder %s3158_s26, %s2802_s6  ;;  %p2804_p6 = pneg %p3172_p4 }
  0x65   : > { %s2807_s11 = scalar_lea.hbm %s3662_s0, 9472  ;;  %p2808_p12 = scmp.lt.u32.totalorder %s3158_s26, %s3662_s0 }
  0x66   : > { %p2805_p8 = pnand %p2804_p6, %p2803_p5  ;;  %p2809_p2 = scmp.lt.u32.totalorder %s2807_s11, %s2802_s6 }
  0x67   : > { %p2811_p1 = scmp.lt.u32.totalorder %s2802_s6, %s3158_s26 }
  0x68   : > { %p2806_p10 = pneg %p2805_p8  ;;  %p2810_p0 = por %p2809_p2, %p2808_p12 }
  0x6a   : > { %p2812_p3 = por %p2811_p1, %p2810_p0 }
  0x6c   : > { %p2813_p13 = pnand %p2812_p3, %p2806_p10 }
  0x6e   : > { %2816 = shalt.err (!%p2813_p13)
}
  0x6f   : > { %s2817_s8 = scalar_lea.vmem %s3176_s20, 4736  ;;  %s2964_s4 = smov [#allocation2]  }
  0x70   : > { %p2818_p7 = scmp.ne.s32.totalorder %s3176_s20, %s2817_s8  ;;  %s2822_s5 = sshll.u32 %s2964_s4, 4  ;;  %s2823_s5 = int_to_ptr.vmem [resolvable:$false] %s2822_s5 }
  0x71   : > { %s2824_s12 = scalar_lea.vmem %s2823_s5, 9472  ;;  %p2825_p5 = scmp.lt.s32.totalorder %s3176_s20, %s2823_s5 }
  0x72   : > { %p2820_p9 = pnand %p2818_p7, %p2804_p6  ;;  %p2826_p8 = scmp.lt.s32.totalorder %s2824_s12, %s2817_s8 }
  0x74   : > { %p2821_p11 = pneg %p2820_p9  ;;  %p2827_p12 = por %p2826_p8, %p2825_p5 }
  0x76   : > { %p2828_p2 = pnand %p2827_p12, %p2821_p11 }
  0x78   : > { %2831 = shalt.err (!%p2828_p2)
}
  0x79   : > { %s2965_s6 = smov 128   ;;  %s2966_s1 = smov 8  }
  0x7a   : > { %2607 = dma.hbm_to_vmem [thread:$0]  (!%p3172_p4), %s3158_s26, 4736, %s3176_s20, %s3178_s15, %s2965_s6, %s2965_s6, %s2966_s1  }
  0x7b   : > { %p3692_p6 = scmp.ne.s32.totalorder %s3684_s30, 0 }
  0x7c   : > { %s195_s9 = sand.u32 (!%p3692_p6), 1, %s2934_s16   ;;  %p3693_p10 = scmp.ne.s32.totalorder (!%p3692_p6), %s3680_s27, 0 }
  0x7d   : > { %193 = sbr.rel (%p3692_p6) target bundleno = 538 (0x21a), region = 32  ;;  %s196_s23 = scalar_lea.sflag (!%p3692_p6), [#allocation3], %s195_s9 }
  0x7e   : > { %s2584_s11 = smul.u32 (!%p3692_p6), 296, %s195_s9 }
  0x80   : > { %s199_s24 = scalar_lea.vmem (!%p3692_p6), [#allocation2], %s2584_s11 }
  0x84   : > { %2905 = dma.done.wait (%p3693_p10), %s196_s23, 4736  }
  0x85   : > { %2907 = vsyncadd (%p3693_p10), %s196_s23, 4294962560  ;;  %p3694_p0 = scmp.ne.s32.totalorder %s3679_s25, 0 }
  0x87   : > { %2909 = dma.done.wait (%p3694_p0), [#allocation6], 304  }
  0x88   : > { %2911 = vsyncadd (%p3694_p0), [#allocation6], 4294966992  ;;  %s2083_s20 = sshll.u32 %s2942_s18, 7  ;;  %vm357_vm0 = vcmask 1041408   ;;  %v262_v0 = vld [vmem:[#allocation5 + $0x2] sm:$0x3] }
  0x89   : > { %s3218_s30 = scalar_lea.vmem %s199_s24, %s2083_s20 [#allocation2]  ;;  %v3220_v1 = vld [vmem:[#allocation5 + $0x8] sm:$0x3]  ;;  %2572 = vmatprep.subr.msk.bf16.mxu1 %vm357_vm0, %v262_v0  ;;  %v359_v3 = vsel %vm357_vm0, %v262_v0, 0  ;;  %vm263_vm1 = vsmask.f32 7424  ;;  %vm332_vm2 = vcmask 31744  }
  0x8a   : > { %v234_v2 = vld [vmem:[%s3218_s30] sm:$0xff]  ;;  %2576 = vmatprep.subr.msk.bf16.mxu0 %vm357_vm0, %v3220_v1  ;;  %v3229_v4 = vsel %vm357_vm0, %v3220_v1, 0  ;;  %v235_v5 = vld [vmem:[%s3218_s30 + $0x8] sm:$0xff]  ;;  %v236_v6 = vld [vmem:[%s3218_s30 + $0x10] sm:$0xff]  ;;  %2281 = vmatpush3.bf16.msra.mxu1 %v359_v3  ;;  %vm585_vm3 = vcmask 1046528   ;;  %s227_s25 = sand.u32 1, %s2922_s13  }
  0x8b   : > { %v237_v7 = vld [vmem:[%s3218_s30 + $0x18] sm:$0xff]  ;;  %2353 = vmatpush3.bf16.msra.mxu0 %v3229_v4  ;;  %v3235_v8 = vpack.c.bf16 %v235_v5, %v234_v2  ;;  %v259_v10 = vld [vmem:[#allocation5] sm:$0x3]  ;;  %v2111_v11 = vld [vmem:[%s3218_s30 + $0x20] sm:$0xff]  ;;  %s3542_s27 = sshll.u32 %s227_s25, 7  ;;  %s2194_s7 = sshll.u32 %s2942_s18, 4 }
  0x8c   : > { %v3237_v9 = vpack.c.bf16 %v237_v7, %v236_v6  ;;  %v2112_v12 = vld [vmem:[%s3218_s30 + $0x28] sm:$0xff]  ;;  %2573 = vmatprep.subr.msk.bf16.mxu1 %vm357_vm0, %v259_v10  ;;  %v1116_v14 = vld [vmem:[#allocation5 + $0xa] sm:$0x3]  ;;  %v2113_v15 = vld [vmem:[%s3218_s30 + $0x30] sm:$0xff]  ;;  %v475_v25 = vsel %vm357_vm0, %v259_v10, 0  ;;  %s3553_s26 = scalar_lea.vmem [#allocation8], %s3542_s27 }
  0x8d   : > { %v3242_v13 = vpack.c.bf16 %v2112_v12, %v2111_v11  ;;  %v2114_v16 = vld [vmem:[%s3218_s30 + $0x38] sm:$0xff]  ;;  %v265_v17 = vshrl.u32 %v3235_v8, 16  ;;  %v267_v18 = vshll.u32 %v3235_v8, 16  ;;  %2578 = vmatprep.subr.msk.bf16.mxu0 %vm357_vm0, %v1116_v14  ;;  %v2115_v21 = vld [vmem:[%s3218_s30 + $0x40] sm:$0xff]  ;;  %v2116_v22 = vld [vmem:[%s3218_s30 + $0x48] sm:$0xff]  ;;  %v1168_v35 = vsel %vm357_vm0, %v1116_v14, 0 }
  0x8e   : > { %v272_v19 = vshll.u32 %v3237_v9, 16  ;;  %v276_v20 = vshrl.u32 %v3237_v9, 16  ;;  %v3256_v26 = vpack.c.bf16 %v2114_v16, %v2113_v15  ;;  %v2117_v27 = vld [vmem:[%s3218_s30 + $0x50] sm:$0xff]  ;;  %v2118_v28 = vld [vmem:[%s3218_s30 + $0x58] sm:$0xff]  ;;  %v3260_v31 = vpack.c.bf16 %v2116_v22, %v2115_v21  ;;  %v246_v44 = vld [vmem:[%s3218_s30 + $0x60] sm:$0xff]  ;;  %s2195_s15 = sshll.u32 %s2946_s19, 5 }
  0x8f   : > { %v921_v23 = vshll.u32 %v3242_v13, 16  ;;  %v925_v24 = vshrl.u32 %v3242_v13, 16  ;;  %v269_v29 = vrot.slane %v267_v18, 1  ;;  %v3262_v32 = vpack.c.bf16 %v2118_v28, %v2117_v27  ;;  %v247_v45 = vld [vmem:[%s3218_s30 + $0x68] sm:$0xff]  ;;  %v248_v49 = vld [vmem:[%s3218_s30 + $0x70] sm:$0xff]  ;;  %v249_v50 = vld [vmem:[%s3218_s30 + $0x78] sm:$0xff]  ;;  %s1955_s8 = sadd.s32 %s2195_s15, %s2194_s7 }
  0x90   : > { %v274_v30 = vrot.slane %v272_v19, 1  ;;  %v928_v34 = vshll.u32 %v3256_v26, 16  ;;  %v932_v36 = vshrl.u32 %v3256_v26, 16  ;;  %v935_v39 = vshll.u32 %v3260_v31, 16  ;;  %v1311_v53 = vld [vmem:[#allocation5 + $0xc] sm:$0x3] }
  0x91   : > { %v923_v33 = vrot.slane %v921_v23, 1  ;;  %v270_v37 = vor.u32 %v269_v29, %v265_v17  ;;  %v939_v42 = vshrl.u32 %v3260_v31, 16  ;;  %v942_v43 = vshll.u32 %v3262_v32, 16  ;;  %v250_v55 = vld [vmem:[%s3218_s30 + $0x80] sm:$0xff]  ;;  %v3287_v56 = vld [vmem:[#allocation5 + $0x4] sm:$0x3] }
  0x92   : > { %v278_v38 = vor.u32 %v276_v20, %v274_v30  ;;  %v930_v41 = vrot.slane %v928_v34, 1  ;;  %v937_v48 = vrot.slane %v935_v39, 1  ;;  %v3284_v54 = vpack.c.bf16 %v247_v45, %v246_v44  ;;  %v2124_v19 = vld [vmem:[%s3218_s30 + $0x88] sm:$0xff]  ;;  %v2166_v23 = vld [vmem:[%s3218_s30 + $0x98] sm:$0xff]  ;;  %v2125_v28 = vld [vmem:[%s3218_s30 + $0x90] sm:$0xff]  ;;  %s2196_s18 = sshll.u32 %s1955_s8, 7 }
  0x93   : > { %v927_v40 = vor.u32 %v925_v24, %v923_v33  ;;  %v275_v46 = vsel %vm263_vm1, %v270_v37, %v274_v30  ;;  %v944_v59 = vrot.slane %v942_v43, 1  ;;  %v3292_v60 = vpack.c.bf16 %v249_v50, %v248_v49  ;;  %s1958_s19 = sshll.u32 %s3553_s26, 4  ;;  %s3593_s12 = scalar_lea.hbm %s3665_s3, %s2196_s18  ;;  %s3595_s19 = int_to_ptr.vmem [resolvable:$true] %s1958_s19 }
  0x94   : > { %v924_v47 = vsel %vm263_vm1, %v278_v38, %v923_v33  ;;  %2282 = vmatprep.mubr.msk.bf16.mxu1 %vm332_vm2, %v275_v46  ;;  %v934_v52 = vor.u32 %v932_v36, %v930_v41  ;;  %v941_v58 = vor.u32 %v939_v42, %v937_v48  ;;  %v1126_v61 = vrot.slane %v3237_v9, 1  ;;  %v1454_v46 = vld [vmem:[#allocation5 + $0xe] sm:$0x3]  ;;  %s3601_s6 = scalar_lea.sflag [#allocation4], %s227_s25  ;;  %s2832_s1 = scalar_lea.vmem %s3595_s19, 2048 }
  0x95   : > { %2354 = vmatprep.mubr.msk.bf16.mxu0 %vm332_vm2, %v924_v47  ;;  %v3279_v51 = vsel %vm263_vm1, %v927_v40, %v930_v41  ;;  %2283 = vmatmul.mubr.msk.bf16.vlgmr.msra.gmra.mrb[0].mxu1 %vm332_vm2, %v924_v47  ;;  %v1127_v62 = vrot.slane %v3242_v13, 1  ;;  %v308_v63 = vshrl.u32 %v3262_v32, 16  ;;  %v312_v0 = vshll.u32 %v3284_v54, 16  ;;  %p2833_p4 = scmp.ne.s32.totalorder %s3595_s19, %s2832_s1  ;;  %p3695_p1 = scmp.ne.s32.totalorder %s3681_s28, 0 }
  0x96   : > { %2355 = vmatmul.mubr.msk.bf16.vlgmr.msra.gmra.mrb[0].mxu0 %vm332_vm2, %v3279_v51  ;;  %2299 = vmatpush3.bf16.msra.mxu1 %v475_v25  ;;  %v3290_v57 = vsel %vm263_vm1, %v934_v52, %v937_v48  ;;  %v320_v2 = vshll.u32 %v3292_v60, 16  ;;  %v260_v3 = vpack.c.bf16 %v250_v55, %v250_v55  ;;  %v316_v5 = vshrl.u32 %v3284_v54, 16  ;;  %s2967_s9 = smov [#allocation8]  }
  0x97   : > { %2371 = vmatpush3.bf16.msra.mxu0 %v1168_v35  ;;  %2286 = vmatprep.mubr.msk.bf16.mxu1 %vm332_vm2, %v3279_v51  ;;  %v3308_v6 = vsel %vm263_vm1, %v941_v58, %v944_v59  ;;  %v1129_v7 = vrot.slane %v3256_v26, 1  ;;  %v3314_v10 = vsel %vm585_vm3, %v1126_v61, %v1127_v62  ;;  %v310_v11 = vor.u32 %v944_v59, %v308_v63  ;;  %v2167_v35 = vld [vmem:[%s3218_s30 + $0xa0] sm:$0xff]  ;;  %p2834_p3 = pnand %p2833_p4, %p3695_p1  ;;  %s2836_s11 = sshll.u32 %s2967_s9, 4  ;;  %s2837_s11 = int_to_ptr.vmem [resolvable:$false] %s2836_s11 }
  0x98   : > { %2358 = vmatprep.mubr.msk.bf16.mxu0 %vm332_vm2, %v3290_v57  ;;  %2579 = vmatprep.subr.msk.bf16.mxu0 %vm357_vm0, %v1311_v53  ;;  %v314_v12 = vrot.slane %v312_v0, 1  ;;  %v1131_v14 = vrot.slane %v3260_v31, 1  ;;  %v322_v15 = vrot.slane %v320_v2, 1  ;;  %v324_v16 = vshrl.u32 %v3292_v60, 16  ;;  %s2838_s23 = scalar_lea.vmem %s2837_s11, 4096  ;;  %p2839_p7 = scmp.lt.s32.totalorder %s3595_s19, %s2837_s11 }
  0x99   : > { %2574 = vmatprep.subr.msk.bf16.mxu1 %vm357_vm0, %v3287_v56  ;;  %v328_v17 = vshll.u32 %v260_v3, 16  ;;  %v1133_v18 = vrot.slane %v3262_v32, 1  ;;  %v3329_v21 = vsel %vm585_vm3, %v1127_v62, %v1129_v7  ;;  %v1337_v22 = vsel %vm357_vm0, %v1311_v53, 0  ;;  %p2835_p13 = pneg %p2834_p3  ;;  %p2840_p9 = scmp.lt.s32.totalorder %s2838_s23, %s2832_s1 }
  0x9a   : > { %v318_v20 = vor.u32 %v316_v5, %v314_v12  ;;  %v3334_v24 = vsel %vm585_vm3, %v1129_v7, %v1131_v14  ;;  %v1135_v25 = vrot.slane %v3284_v54, 1  ;;  %v3337_v27 = vpack.c.bf16 %v2124_v19, %v250_v55  ;;  %v771_v19 = vld [vmem:[#allocation5 + $0x6] sm:$0x3] }
  0x9b   : > { %v3341_v29 = vsel %vm263_vm1, %v310_v11, %v314_v12  ;;  %v326_v30 = vor.u32 %v324_v16, %v322_v15  ;;  %v330_v33 = vrot.slane %v328_v17, 1  ;;  %v3344_v34 = vsel %vm585_vm3, %v1131_v14, %v1133_v18  ;;  %p2841_p11 = por %p2840_p9, %p2839_p7 }
  0x9c   : > { %v3348_v36 = vsel %vm263_vm1, %v318_v20, %v322_v15  ;;  %v3350_v37 = vpack.c.bf16 %v2166_v23, %v2125_v28  ;;  %v599_v38 = vrot.slane %v3292_v60, 1  ;;  %v912_v39 = vpack.c.bf16 %v2125_v28, %v2125_v28  ;;  %v1656_v23 = vld [vmem:[#allocation5 + $0x10] sm:$0x3] }
  0x9d   : > { %2287 = vmatmul.mubr.msk.bf16.gmra.mrb[4].mxu1 %vm332_vm2, %v3290_v57  ;;  %v601_v40 = vrot.slane %v260_v3, 1  ;;  %v1496_v41 = vshll.u32 %v3337_v27, 16  ;;  %v1139_v42 = vrot.slane %v3337_v27, 1  ;;  %v1500_v43 = vshrl.u32 %v3337_v27, 16  ;;  %p2842_p5 = pnand %p2841_p11, %p2835_p13 }
  0x9e   : > { %2359 = vmatmul.mubr.msk.bf16.gmra.mrb[4].mxu0 %vm332_vm2, %v3308_v6  ;;  %2290 = vmatprep.mubr.msk.bf16.mxu1 %vm332_vm2, %v3308_v6  ;;  %v1503_v44 = vshll.u32 %v3350_v37, 16  ;;  %v1452_v45 = vpack.c.bf16 %v2167_v35, %v2167_v35  ;;  %v1507_v49 = vshrl.u32 %v3350_v37, 16  ;;  %v1679_v63 = vrot.slane %v3350_v37, 1 }
  0x9f   : > { %2372 = vmatprep.mubr.msk.bf16.mxu0 %vm332_vm2, %v3314_v10  ;;  %v3358_v47 = vsel %vm585_vm3, %v599_v38, %v601_v40  ;;  %v1498_v48 = vrot.slane %v1496_v41, 1  ;;  %v3366_v53 = vsel %vm585_vm3, %v599_v38, %v1139_v42  ;;  %v971_v2 = vshll.u32 %v912_v39, 16 }
  0xa0   : > { %v1505_v50 = vrot.slane %v1503_v44, 1  ;;  %v1511_v52 = vshll.u32 %v1452_v45, 16  ;;  %v3384_v5 = vsel %vm585_vm3, %v1139_v42, %v1679_v63  ;;  %v1681_v7 = vrot.slane %v1452_v45, 1 }
  0xa1   : > { %v3371_v55 = vsel %vm263_vm1, %v326_v30, %v1498_v48  ;;  %v1502_v58 = vor.u32 %v1500_v43, %v1498_v48  ;;  %v331_v11 = vsel %vm263_vm1, %v326_v30, %v330_v33  ;;  %v973_v12 = vrot.slane %v971_v2, 1 }
  0xa2   : > { %v1509_v59 = vor.u32 %v1507_v49, %v1505_v50  ;;  %v1513_v62 = vrot.slane %v1511_v52, 1  ;;  %v3388_v14 = vsel %vm585_vm3, %v1133_v18, %v1135_v25  ;;  %v3391_v15 = vsel %vm585_vm3, %v1679_v63, %v1681_v7 }
  0xa3   : > { %v3378_v0 = vsel %vm263_vm1, %v1502_v58, %v1505_v50  ;;  %v3394_v16 = vsel %vm263_vm1, %v1502_v58, %v973_v12  ;;  %v3404_v17 = vsel %vm585_vm3, %v1135_v25, %v599_v38  ;;  %v628_v18 = vsel %vm357_vm0, %v3287_v56, 0 }
  0xa4   : > { %v3381_v3 = vsel %vm263_vm1, %v1509_v59, %v1513_v62  ;;  %v1141_v20 = vrot.slane %v912_v39, 1  ;;  %v1540_v56 = vsel %vm357_vm0, %v1454_v46, 0  ;;  %v586_v25 = vrot.slane %v3235_v8, 1 }
  0xa5   : > { %2291 = vmatmul.mubr.msk.bf16.gmra.mrb[8].mxu1 %vm332_vm2, %v3341_v29  ;;  %v797_v30 = vsel %vm357_vm0, %v771_v19, 0 }
  0xa6   : > { %2373 = vmatmul.mubr.msk.bf16.vlgmr.msra.gmra.mrb[0].mxu0 %vm332_vm2, %v3329_v21  ;;  %2294 = vmatprep.mubr.msk.bf16.mxu1 %vm332_vm2, %v3348_v36  ;;  %v588_v28 = vsel %vm585_vm3, %v586_v25, %v1126_v61 }
  0xa7   : > { %2389 = vmatpush3.bf16.msra.mxu0 %v1337_v22  ;;  %2376 = vmatprep.mubr.msk.bf16.mxu0 %vm332_vm2, %v3334_v24  ;;  %v1142_v22 = vsel %vm585_vm3, %v1139_v42, %v1141_v20 }
  0xa8   : > { %2580 = vmatprep.subr.msk.bf16.mxu0 %vm357_vm0, %v1454_v46 }
  0xad   : > { %2295 = vmatmul.mubr.msk.bf16.gmra.mrb[12].mxu1 %vm332_vm2, %v331_v11 }
  0xae   : > { %2377 = vmatmul.mubr.msk.bf16.gmra.mrb[4].mxu0 %vm332_vm2, %v3344_v34  ;;  %2300 = vmatprep.mubr.msk.bf16.mxu1 %vm332_vm2, %v3235_v8  ;;  %v1708_v8 = vsel %vm357_vm0, %v1656_v23, 0 }
  0xaf   : > { %2380 = vmatprep.mubr.msk.bf16.mxu0 %vm332_vm2, %v3388_v14 }
  0xb5   : > { %2301 = vmatmul.mubr.msk.bf16.vlgmr.msra.gmra.mrb[0].mxu1 %vm332_vm2, %v3237_v9 }
  0xb6   : > { %2381 = vmatmul.mubr.msk.bf16.gmra.mrb[8].mxu0 %vm332_vm2, %v3404_v17  ;;  %2317 = vmatpush3.bf16.msra.mxu1 %v628_v18 }
  0xb7   : > { %2304 = vmatprep.mubr.msk.bf16.mxu1 %vm332_vm2, %v3242_v13  ;;  %2384 = vmatprep.mubr.msk.bf16.mxu0 %vm332_vm2, %v3366_v53 }
  0xb8   : > { %2575 = vmatprep.subr.msk.bf16.mxu1 %vm357_vm0, %v771_v19 }
  0xbd   : > { %2305 = vmatmul.mubr.msk.bf16.gmra.mrb[4].mxu1 %vm332_vm2, %v3256_v26 }
  0xbe   : > { %2385 = vmatmul.mubr.msk.bf16.gmra.mrb[12].mxu0 %vm332_vm2, %v1142_v22  ;;  %2308 = vmatprep.mubr.msk.bf16.mxu1 %vm332_vm2, %v3260_v31 }
  0xbf   : > { %2390 = vmatprep.mubr.msk.bf16.mxu0 %vm332_vm2, %v3242_v13 }
  0xc5   : > { %2309 = vmatmul.mubr.msk.bf16.gmra.mrb[8].mxu1 %vm332_vm2, %v3262_v32 }
  0xc6   : > { %2391 = vmatmul.mubr.msk.bf16.vlgmr.msra.gmra.mrb[0].mxu0 %vm332_vm2, %v3256_v26  ;;  %2312 = vmatprep.mubr.msk.bf16.mxu1 %vm332_vm2, %v3284_v54 }
  0xc7   : > { %2407 = vmatpush3.bf16.msra.mxu0 %v1540_v56  ;;  %2394 = vmatprep.mubr.msk.bf16.mxu0 %vm332_vm2, %v3260_v31 }
  0xc8   : > { %2581 = vmatprep.subr.msk.bf16.mxu0 %vm357_vm0, %v1656_v23 }
  0xcd   : > { %2313 = vmatmul.mubr.msk.bf16.gmra.mrb[12].mxu1 %vm332_vm2, %v3292_v60 }
  0xce   : > { %2395 = vmatmul.mubr.msk.bf16.gmra.mrb[4].mxu0 %vm332_vm2, %v3262_v32  ;;  %2318 = vmatprep.mubr.msk.bf16.mxu1 %vm332_vm2, %v588_v28 }
  0xcf   : > { %2398 = vmatprep.mubr.msk.bf16.mxu0 %vm332_vm2, %v3284_v54 }
  0xd5   : > { %2319 = vmatmul.mubr.msk.bf16.vlgmr.msra.gmra.mrb[0].mxu1 %vm332_vm2, %v3314_v10 }
  0xd6   : > { %2399 = vmatmul.mubr.msk.bf16.gmra.mrb[8].mxu0 %vm332_vm2, %v3292_v60  ;;  %2335 = vmatpush3.bf16.msra.mxu1 %v797_v30 }
  0xd7   : > { %2322 = vmatprep.mubr.msk.bf16.mxu1 %vm332_vm2, %v3329_v21  ;;  %2402 = vmatprep.mubr.msk.bf16.mxu0 %vm332_vm2, %v3337_v27 }
  0xd8   : > { %2577 = vmatprep.subr.msk.bf16.mxu1 %vm357_vm0, %v3220_v1 }
  0xdd   : > { %2323 = vmatmul.mubr.msk.bf16.gmra.mrb[4].mxu1 %vm332_vm2, %v3334_v24 }
  0xde   : > { %2403 = vmatmul.mubr.msk.bf16.gmra.mrb[12].mxu0 %vm332_vm2, %v3350_v37  ;;  %2326 = vmatprep.mubr.msk.bf16.mxu1 %vm332_vm2, %v3344_v34 }
  0xdf   : > { %2408 = vmatprep.mubr.msk.bf16.mxu0 %vm332_vm2, %v3279_v51 }
  0xe5   : > { %2327 = vmatmul.mubr.msk.bf16.gmra.mrb[8].mxu1 %vm332_vm2, %v3388_v14 }
  0xe6   : > { %2409 = vmatmul.mubr.msk.bf16.vlgmr.msra.gmra.mrb[0].mxu0 %vm332_vm2, %v3290_v57  ;;  %2330 = vmatprep.mubr.msk.bf16.mxu1 %vm332_vm2, %v3404_v17  ;;  %v3527_v57 = vld [vmem:[#allocation7] ss:$0 sm:$0xff] }
  0xe7   : > { %2425 = vmatpush3.bf16.msra.mxu0 %v1708_v8  ;;  %2412 = vmatprep.mubr.msk.bf16.mxu0 %vm332_vm2, %v3308_v6 }
  0xed   : > { %2331 = vmatmul.mubr.msk.bf16.gmra.mrb[12].mxu1 %vm332_vm2, %v3358_v47 }
  0xee   : > { %2413 = vmatmul.mubr.msk.bf16.gmra.mrb[4].mxu0 %vm332_vm2, %v3341_v29  ;;  %2336 = vmatprep.mubr.msk.bf16.mxu1 %vm332_vm2, %v3237_v9 }
  0xef   : > { %2416 = vmatprep.mubr.msk.bf16.mxu0 %vm332_vm2, %v3348_v36 }
  0xf5   : > { %2337 = vmatmul.mubr.msk.bf16.vlgmr.msra.gmra.mrb[0].mxu1 %vm332_vm2, %v3242_v13 }
  0xf6   : > { %2417 = vmatmul.mubr.msk.bf16.gmra.mrb[8].mxu0 %vm332_vm2, %v3371_v55  ;;  %2443 = vmatpush3.bf16.msra.mxu1 %v3229_v4 }
  0xf7   : > { %2340 = vmatprep.mubr.msk.bf16.mxu1 %vm332_vm2, %v3256_v26  ;;  %2420 = vmatprep.mubr.msk.bf16.mxu0 %vm332_vm2, %v3378_v0 }
  0xfd   : > { %2341 = vmatmul.mubr.msk.bf16.gmra.mrb[4].mxu1 %vm332_vm2, %v3260_v31 }
  0xfe   : > { %2421 = vmatmul.mubr.msk.bf16.gmra.mrb[12].mxu0 %vm332_vm2, %v3381_v3  ;;  %2344 = vmatprep.mubr.msk.bf16.mxu1 %vm332_vm2, %v3262_v32 }
  0xff   : > { %2426 = vmatprep.mubr.msk.bf16.mxu0 %vm332_vm2, %v3329_v21 }
 0x105   : > { %2345 = vmatmul.mubr.msk.bf16.gmra.mrb[8].mxu1 %vm332_vm2, %v3284_v54 }
 0x106   : > { %2427 = vmatmul.mubr.msk.bf16.vlgmr.msra.gmra.mrb[0].mxu0 %vm332_vm2, %v3334_v24  ;;  %2348 = vmatprep.mubr.msk.bf16.mxu1 %vm332_vm2, %v3292_v60 }
 0x107   : > { %2430 = vmatprep.mubr.msk.bf16.mxu0 %vm332_vm2, %v3344_v34 }
 0x10d   : > { %2349 = vmatmul.mubr.msk.bf16.gmra.mrb[12].mxu1 %vm332_vm2, %v3337_v27 }
 0x10e   : > { %2431 = vmatmul.mubr.msk.bf16.gmra.mrb[4].mxu0 %vm332_vm2, %v3388_v14  ;;  %2362 = vmatprep.mubr.msk.bf16.mxu1 %vm332_vm2, %v3341_v29 }
 0x10f   : > { %2434 = vmatprep.mubr.msk.bf16.mxu0 %vm332_vm2, %v3404_v17 }
 0x115   : > { %2363 = vmatmul.mubr.msk.bf16.vlgmr.msra.gmra.mrb[8].mxu1 %vm332_vm2, %v3348_v36 }
 0x116   : > { %2435 = vmatmul.mubr.msk.bf16.gmra.mrb[8].mxu0 %vm332_vm2, %v3366_v53  ;;  %2366 = vmatprep.mubr.msk.bf16.mxu1 %vm332_vm2, %v3371_v55 }
 0x117   : > { %2438 = vmatprep.mubr.msk.bf16.mxu0 %vm332_vm2, %v3384_v5 }
 0x11d   : > { %2367 = vmatmul.mubr.msk.bf16.gmra.mrb[12].mxu1 %vm332_vm2, %v3394_v16 }
 0x11e   : > { %2439 = vmatmul.mubr.msk.bf16.gmra.mrb[12].mxu0 %vm332_vm2, %v3391_v15 }
 0x1c8   : > { %v2338_v1 = vpop.f32.mrb[0].mxu1 }
 0x1c9   : > { %v833_v4 = vpop.f32.mrb[1].mxu1 }
 0x1ca   : > { %v2339_v9 = vpop.f32.mrb[2].mxu1 }
 0x1cb   : > { %v836_v13 = vpop.f32.mrb[3].mxu1 }
 0x1d0   : > { %v2342_v26 = vpop.f32.mrb[4].mxu1 }
 0x1d1   : > { %v849_v31 = vpop.f32.mrb[5].mxu1 }
 0x1d2   : > { %v2343_v32 = vpop.f32.mrb[6].mxu1 }
 0x1d3   : > { %v852_v51 = vpop.f32.mrb[7].mxu1 }
 0x1d9   : > { %v2428_v54 = vpop.f32.mrb[0].mxu0 }
 0x1da   : > { %v2444_v60 = vadd.f32 %v2428_v54, %v2338_v1  ;;  %v1744_v61 = vpop.f32.mrb[1].mxu0 }
 0x1db   : > { %v2445_v6 = vadd.f32 %v1744_v61, %v833_v4  ;;  %v2429_v10 = vpop.f32.mrb[2].mxu0 }
 0x1dc   : > { %v1832_v21 = vadd.f32 %v2444_v60, %v3527_v57  ;;  %v2446_v24 = vadd.f32 %v2429_v10, %v2339_v9  ;;  %v1747_v27 = vpop.f32.mrb[3].mxu0 }
 0x1dd   : > { %v1830_v29 = vadd.f32 %v2445_v6, %v3527_v57  ;;  %v2447_v33 = vadd.f32 %v1747_v27, %v836_v13 }
 0x1de   : > { %v1864_v34 = vmul.f32 0.70710677, %v1832_v21  ;;  %v1833_v35 = vadd.f32 %v2446_v24, %v3527_v57  ;;  %v1848_v2 = vmul.f32 0.5, %v1832_v21 }
 0x1df   : > { %v1862_v36 = vmul.f32 0.70710677, %v1830_v29  ;;  %v1831_v37 = vadd.f32 %v2447_v33, %v3527_v57  ;;  %v1846_v14 = vmul.f32 0.5, %v1830_v29 }
 0x1e0   : > { %2714 = verf.f32 %v1864_v34  ;;  %v1865_v38 = vmul.f32 0.70710677, %v1833_v35  ;;  %v1849_v20 = vmul.f32 0.5, %v1833_v35 }
 0x1e1   : > { %2716 = verf.f32 %v1862_v36  ;;  %v1863_v39 = vmul.f32 0.70710677, %v1831_v37  ;;  %v2432_v40 = vpop.f32.mrb[4].mxu0  ;;  %v1847_v13 = vmul.f32 0.5, %v1831_v37 }
 0x1e2   : > { %2718 = verf.f32 %v1865_v38  ;;  %v2448_v41 = vadd.f32 %v2432_v40, %v2342_v26  ;;  %v1760_v42 = vpop.f32.mrb[5].mxu0 }
 0x1e3   : > { %2720 = verf.f32 %v1863_v39  ;;  %v2449_v43 = vadd.f32 %v1760_v42, %v849_v31  ;;  %v2433_v44 = vpop.f32.mrb[6].mxu0 }
 0x1e4   : > { %v1836_v45 = vadd.f32 %v2448_v41, %v3527_v57  ;;  %v2450_v46 = vadd.f32 %v2433_v44, %v2343_v32  ;;  %v1763_v47 = vpop.f32.mrb[7].mxu0 }
 0x1e5   : > { %v1834_v48 = vadd.f32 %v2449_v43, %v3527_v57  ;;  %v2451_v49 = vadd.f32 %v1763_v47, %v852_v51 }
 0x1e6   : > { %v1868_v50 = vmul.f32 0.70710677, %v1836_v45  ;;  %v1837_v52 = vadd.f32 %v2450_v46, %v3527_v57  ;;  %v1852_v27 = vmul.f32 0.5, %v1836_v45 }
 0x1e7   : > { %v1866_v53 = vmul.f32 0.70710677, %v1834_v48  ;;  %v3538_v55 = vadd.f32 %v2451_v49, %v3527_v57  ;;  %v1850_v29 = vmul.f32 0.5, %v1834_v48 }
 0x1e8   : > { %2722 = verf.f32 %v1868_v50  ;;  %v1869_v58 = vmul.f32 0.70710677, %v1837_v52  ;;  %v2364_v62 = vpop.f32.mrb[8].mxu1  ;;  %v1853_v39 = vmul.f32 0.5, %v1837_v52 }
 0x1e9   : > { %2724 = verf.f32 %v1866_v53  ;;  %v1867_v59 = vmul.f32 0.70710677, %v3538_v55  ;;  %v2436_v63 = vpop.f32.mrb[8].mxu0  ;;  %v1068_v5 = vpop.f32.mrb[9].mxu1 }
 0x1ea   : > { %v2715_v0 = vpop.eup %2714  ;;  %2726 = verf.f32 %v1869_v58  ;;  %v2452_v3 = vadd.f32 %v2436_v63, %v2364_v62  ;;  %v1776_v7 = vpop.f32.mrb[9].mxu0  ;;  %v1851_v62 = vmul.f32 0.5, %v3538_v55 }
 0x1eb   : > { %v2717_v11 = vpop.eup %2716  ;;  %v1896_v12 = vadd.f32 1.0, %v2715_v0  ;;  %2728 = verf.f32 %v1867_v59  ;;  %v2453_v15 = vadd.f32 %v1776_v7, %v1068_v5  ;;  %v2365_v16 = vpop.f32.mrb[10].mxu1 }
 0x1ec   : > { %v2437_v17 = vpop.f32.mrb[10].mxu0  ;;  %v2719_v18 = vpop.eup %2718  ;;  %v1894_v19 = vadd.f32 1.0, %v2717_v11  ;;  %v3546_v22 = vadd.f32 %v2452_v3, %v3527_v57 }
 0x1ed   : > { %v2454_v56 = vadd.f32 %v2437_v17, %v2365_v16  ;;  %v1071_v23 = vpop.f32.mrb[11].mxu1  ;;  %v1779_v25 = vpop.f32.mrb[11].mxu0  ;;  %v1912_v30 = vmul.f32 %v1896_v12, %v1848_v2  ;;  %v1897_v8 = vadd.f32 1.0, %v2719_v18  ;;  %v3549_v1 = vadd.f32 %v2453_v15, %v3527_v57 }
 0x1ee   : > { %v2721_v28 = vpop.eup %2720  ;;  %v2455_v4 = vadd.f32 %v1779_v25, %v1071_v23  ;;  %v1910_v9 = vmul.f32 %v1894_v19, %v1846_v14  ;;  %v1872_v31 = vmul.f32 0.70710677, %v3546_v22  ;;  %v1856_v16 = vmul.f32 0.5, %v3546_v22 }
 0x1ef   : > { %v1895_v26 = vadd.f32 1.0, %v2721_v28  ;;  %1928 = vst [vmem:[%s3553_s26 + $0x10] sm:$0xff] %v1912_v30  ;;  %v1913_v32 = vmul.f32 %v1897_v8, %v1849_v20  ;;  %v1870_v51 = vmul.f32 0.70710677, %v3549_v1  ;;  %v3558_v54 = vadd.f32 %v2454_v56, %v3527_v57 }
 0x1f0   : > { %1926 = vst [vmem:[%s3553_s26] sm:$0xff] %v1910_v9  ;;  %2730 = verf.f32 %v1872_v31  ;;  %v3562_v61 = vadd.f32 %v2455_v4, %v3527_v57  ;;  %v2368_v10 = vpop.f32.mrb[12].mxu1  ;;  %v1854_v18 = vmul.f32 0.5, %v3549_v1 }
 0x1f1   : > { %v1911_v60 = vmul.f32 %v1895_v26, %v1847_v13  ;;  %1929 = vst [vmem:[%s3553_s26 + $0x18] sm:$0xff] %v1913_v32  ;;  %2732 = verf.f32 %v1870_v51  ;;  %v1873_v6 = vmul.f32 0.70710677, %v3558_v54  ;;  %v2440_v21 = vpop.f32.mrb[12].mxu0  ;;  %v1084_v35 = vpop.f32.mrb[13].mxu1  ;;  %v1857_v25 = vmul.f32 0.5, %v3558_v54 }
 0x1f2   : > { %v2723_v24 = vpop.eup %2722  ;;  %v1871_v33 = vmul.f32 0.70710677, %v3562_v61  ;;  %v2456_v34 = vadd.f32 %v2440_v21, %v2368_v10  ;;  %v1792_v36 = vpop.f32.mrb[13].mxu0  ;;  %v1855_v22 = vmul.f32 0.5, %v3562_v61 }
 0x1f3   : > { %1927 = vst [vmem:[%s3553_s26 + $0x8] sm:$0xff] %v1911_v60  ;;  %v2725_v37 = vpop.eup %2724  ;;  %v1900_v38 = vadd.f32 1.0, %v2723_v24  ;;  %2734 = verf.f32 %v1873_v6  ;;  %v2457_v40 = vadd.f32 %v1792_v36, %v1084_v35  ;;  %v2369_v41 = vpop.f32.mrb[14].mxu1 }
 0x1f4   : > { %v2441_v42 = vpop.f32.mrb[14].mxu0  ;;  %v2727_v43 = vpop.eup %2726  ;;  %v1898_v44 = vadd.f32 1.0, %v2725_v37  ;;  %2736 = verf.f32 %v1871_v33  ;;  %v1844_v46 = vadd.f32 %v2456_v34, %v3527_v57 }
 0x1f5   : > { %v2458_v45 = vadd.f32 %v2441_v42, %v2369_v41  ;;  %v1087_v47 = vpop.f32.mrb[15].mxu1  ;;  %v1795_v48 = vpop.f32.mrb[15].mxu0  ;;  %v1916_v50 = vmul.f32 %v1900_v38, %v1852_v27  ;;  %v1901_v53 = vadd.f32 1.0, %v2727_v43  ;;  %v1842_v52 = vadd.f32 %v2457_v40, %v3527_v57 }
 0x1f6   : > { %v2729_v49 = vpop.eup %2728  ;;  %v2459_v58 = vadd.f32 %v1795_v48, %v1087_v47  ;;  %v1914_v59 = vmul.f32 %v1898_v44, %v1850_v29  ;;  %v1876_v0 = vmul.f32 0.70710677, %v1844_v46  ;;  %v1860_v13 = vmul.f32 0.5, %v1844_v46 }
 0x1f7   : > { %v1899_v63 = vadd.f32 1.0, %v2729_v49  ;;  %1932 = vst [vmem:[%s3553_s26 + $0x30] sm:$0xff] %v1916_v50  ;;  %v1917_v2 = vmul.f32 %v1901_v53, %v1853_v39  ;;  %v1874_v3 = vmul.f32 0.70710677, %v1842_v52  ;;  %v1845_v5 = vadd.f32 %v2458_v45, %v3527_v57 }
 0x1f8   : > { %1930 = vst [vmem:[%s3553_s26 + $0x20] sm:$0xff] %v1914_v59  ;;  %2738 = verf.f32 %v1876_v0  ;;  %v1843_v11 = vadd.f32 %v2459_v58, %v3527_v57  ;;  %v1858_v31 = vmul.f32 0.5, %v1842_v52 }
 0x1f9   : > { %v1915_v7 = vmul.f32 %v1899_v63, %v1851_v62  ;;  %1933 = vst [vmem:[%s3553_s26 + $0x38] sm:$0xff] %v1917_v2  ;;  %2740 = verf.f32 %v1874_v3  ;;  %v1877_v12 = vmul.f32 0.70710677, %v1845_v5  ;;  %v1861_v6 = vmul.f32 0.5, %v1845_v5 }
 0x1fa   : > { %v2731_v14 = vpop.eup %2730  ;;  %v1875_v15 = vmul.f32 0.70710677, %v1843_v11  ;;  %v1859_v21 = vmul.f32 0.5, %v1843_v11 }
 0x1fb   : > { %1931 = vst [vmem:[%s3553_s26 + $0x28] sm:$0xff] %v1915_v7  ;;  %v2733_v55 = vpop.eup %2732  ;;  %v1904_v17 = vadd.f32 1.0, %v2731_v14  ;;  %2742 = verf.f32 %v1877_v12 }
 0x1fc   : > { %v1902_v19 = vadd.f32 1.0, %v2733_v55  ;;  %2744 = verf.f32 %v1875_v15 }
 0x1fd   : > { %v2735_v57 = vpop.eup %2734  ;;  %v1920_v20 = vmul.f32 %v1904_v17, %v1856_v16 }
 0x1fe   : > { %v2737_v56 = vpop.eup %2736  ;;  %v1918_v23 = vmul.f32 %v1902_v19, %v1854_v18  ;;  %v1905_v28 = vadd.f32 1.0, %v2735_v57 }
 0x1ff   : > { %1936 = vst [vmem:[%s3553_s26 + $0x50] sm:$0xff] %v1920_v20  ;;  %v1903_v30 = vadd.f32 1.0, %v2737_v56 }
 0x200   : > { %1934 = vst [vmem:[%s3553_s26 + $0x40] sm:$0xff] %v1918_v23  ;;  %v1921_v8 = vmul.f32 %v1905_v28, %v1857_v25 }
 0x201   : > { %v1919_v1 = vmul.f32 %v1903_v30, %v1855_v22 }
 0x202   : > { %v2739_v4 = vpop.eup %2738  ;;  %1937 = vst [vmem:[%s3553_s26 + $0x58] sm:$0xff] %v1921_v8 }
 0x203   : > { %v2741_v9 = vpop.eup %2740  ;;  %1935 = vst [vmem:[%s3553_s26 + $0x48] sm:$0xff] %v1919_v1  ;;  %v1908_v26 = vadd.f32 1.0, %v2739_v4 }
 0x204   : > { %v1906_v32 = vadd.f32 1.0, %v2741_v9 }
 0x205   : > { %v2743_v51 = vpop.eup %2742  ;;  %v1924_v54 = vmul.f32 %v1908_v26, %v1860_v13 }
 0x206   : > { %v2745_v60 = vpop.eup %2744  ;;  %v1922_v61 = vmul.f32 %v1906_v32, %v1858_v31  ;;  %v1909_v10 = vadd.f32 1.0, %v2743_v51 }
 0x207   : > { %1940 = vst [vmem:[%s3553_s26 + $0x70] sm:$0xff] %v1924_v54  ;;  %v1907_v24 = vadd.f32 1.0, %v2745_v60 }
 0x208   : > { %1938 = vst [vmem:[%s3553_s26 + $0x60] sm:$0xff] %v1922_v61  ;;  %v1925_v27 = vmul.f32 %v1909_v10, %v1861_v6 }
 0x209   : > { %v1923_v29 = vmul.f32 %v1907_v24, %v1859_v21 }
 0x20a   : > { %1941 = vst [vmem:[%s3553_s26 + $0x78] sm:$0xff] %v1925_v27 }
 0x20b   : > { %1939 = vst [vmem:[%s3553_s26 + $0x68] sm:$0xff] %v1923_v29 }
 0x20c   : > { %2845 = shalt.err (!%p2842_p5)
}
 0x20d   : > { %s2846_s24 = scalar_lea.hbm %s3593_s12, 2048  ;;  %s2850_s25 = scalar_lea.hbm %s3665_s3, 8192 }
 0x20e   : > { %p2847_p8 = scmp.ne.s32.totalorder %s3593_s12, %s2846_s24  ;;  %p2851_p6 = scmp.lt.u32.totalorder %s3593_s12, %s3665_s3 }
 0x20f   : > { %p2852_p10 = scmp.lt.u32.totalorder %s2850_s25, %s2846_s24  ;;  %p2854_p4 = scmp.lt.u32.totalorder %s2846_s24, %s3593_s12 }
 0x210   : > { %p2848_p12 = pnand %p2847_p8, %p3695_p1 }
 0x211   : > { %p2853_p0 = por %p2852_p10, %p2851_p6 }
 0x212   : > { %p2849_p2 = pneg %p2848_p12 }
 0x213   : > { %p2855_p3 = por %p2854_p4, %p2853_p0 }
 0x215   : > { %p2856_p13 = pnand %p2855_p3, %p2849_p2 }
 0x217   : > { %2859 = shalt.err (!%p2856_p13)
}
 0x218   : > { %s2968_s7 = smov 128   ;;  %s2969_s15 = smov 8  }
 0x219   : > { %2595 = dma.vmem_to_hbm [thread:$0]  (%p3695_p1), %s3595_s19, 2048, %s3593_s12, %s3601_s6, %s2968_s7, %s2968_s7, %s2969_s15  }
 0x21a PF: > { %s3696_s8 = sld [smem:[#allocation12_spill]]  ;;  %s3697_s18 = sld [smem:[#allocation14_spill]] }
 0x21b   : > { %p2617_p7 = scmp.ge.s32.totalorder %s2958_s22, 2 }
 0x220   : > { %s1973_s4 = sand.u32 1, %s3696_s8   ;;  %p3698_p9 = scmp.ne.s32.totalorder %s3697_s18, 0 }
 0x221   : > { %s1974_s5 = scalar_lea.sflag [#allocation4], %s1973_s4 }
 0x222   : > { %p2609_p11 = pnand %p2617_p7, %p3698_p9 }
 0x224   : > { %2913 = dma.done.wait (!%p2609_p11), %s1974_s5, 2048  }
 0x225   : > { %2915 = vsyncadd (!%p2609_p11), %s1974_s5, 4294965248  ;;  %s20_s22 = sadd.s32 1, %s2958_s22   ;;  %s3699_s18 = sld [smem:[#allocation13_spill]] }
 0x226   : > { %p17_p5 = scmp.ge.s32.totalorder %s20_s22, 6   ;;  %s3700_s20 = sld [smem:[#allocation15_spill]] }
 0x227   : > { %s3701_s12 = smov %s2922_s13  ;;  %s3702_s13 = smov %s2926_s14 }
 0x228   : > { %s3703_s14 = smov %s3166_s2  ;;  %s3704_s15 = smov %s2934_s16 }
 0x229   : > { %s3705_s16 = smov %s2938_s17  ;;  %s3706_s17 = smov %s3161_s29 }
 0x22a   : > { %s3707_s19 = smov %s2954_s21  ;;  %s3708_s21 = smov %s3714_s10 }
 0x22b   :  { %19 = sbr.rel (!%p17_p5) target bundleno = 13 (0xd), region = 96 }
 0x232   :  { %1979 = vsyncpa [#allocation3], 1 }
 0x233   :  { %1981 = vsyncpa [#allocation3 + $0x1], 1 }
 0x234   :  { %1982 = vsyncpa [#allocation6], 1 }
 0x235   :  { %1983 = vsyncpa [#allocation4], 1 }
 0x236   :  { %1985 = vsyncpa [#allocation4 + $0x1], 1 }

</bundles_post_ra>
